<compile_context>
chip_gen: v5e
topology: v5e:2x2
jax: 0.10.0
libtpu: 0.0.40
codegen_flags: <defaults>
</compile_context>

<pallas_src>
import functools
import math

import jax
import jax.numpy as jnp
from jax.experimental import pallas as pl
from jax.experimental.pallas import tpu as pltpu

EPS = 1e-5


def _layernorm_kernel(x_ref, w_ref, b_ref, o_ref):
    # x_ref: (tile_rows, hidden); w_ref/b_ref: (1, hidden); o_ref: (tile_rows, hidden)
    x = x_ref[...].astype(jnp.float32)
    mean = jnp.mean(x, axis=-1, keepdims=True)
    xc = x - mean
    var = jnp.mean(xc * xc, axis=-1, keepdims=True)
    inv = jax.lax.rsqrt(var + EPS)
    y = xc * inv * w_ref[...].astype(jnp.float32) + b_ref[...].astype(jnp.float32)
    o_ref[...] = y.astype(o_ref.dtype)


def _ceil_div(a, b):
    return (a + b - 1) // b


def _round_up(a, b):
    return _ceil_div(a, b) * b


def _row_multiple(dtype):
    # Sublane packing: 8 rows for 32-bit, 16 for 16-bit, 32 for 8-bit dtypes.
    itemsize = jnp.dtype(dtype).itemsize
    return max(8, 32 // itemsize)


def _tpu_params():
    """Return (target_tile_bytes, vmem_limit_bytes, num_tensorcores) for the chip."""
    kind = ""
    vmem_cap = None
    try:
        kind = jax.devices()[0].device_kind.lower()
    except Exception:
        pass
    try:
        vmem_cap = pltpu.get_tpu_info().vmem_capacity_bytes
    except Exception:
        pass
    is_v7 = ("v7" in kind) or (vmem_cap is not None and vmem_cap <= (64 << 20))
    if is_v7:
        # v7x: 64 MiB VMEM/TC, ~3.2 TB/s HBM, 2 TensorCores. Large tiles amortize
        # per-step pipeline overhead against the fast HBM.
        return (4 << 20), (48 << 20), 2
    if "v6" in kind:
        # v6e: 128 MiB VMEM, ~1.4 TB/s HBM, 1 TensorCore.
        return (6 << 20), (96 << 20), 1
    # v5e and unknown: 128 MiB VMEM, ~0.82 TB/s HBM; per-step overhead already <10%.
    return (4 << 20), (64 << 20), 1


def _pick_tile_rows(rows, hidden, dtype, target_bytes, num_cores):
    """Row-tile sized near target_bytes of input per block, sublane-aligned, with
    enough grid steps for double-buffering and (v7x) megacore sharding."""
    itemsize = jnp.dtype(dtype).itemsize
    rm = _row_multiple(dtype)
    # Sub-32-bit inputs are upcast to f32 inside the kernel (~3x live bytes of the
    # tile land in compiler-managed scratch) -> shrink the byte target.
    if itemsize < 4:
        target_bytes //= 2
    tr = max(rm, target_bytes // max(1, hidden * itemsize))
    tr = min(tr, 4096)
    tr = max(rm, (tr // rm) * rm)
    # Keep grid_n >= 2*num_cores (pipelining + both TensorCores on v7x) whenever
    # there are enough rows; never exceed rounded-up rows (right-size tiny inputs).
    min_blocks = 2 * num_cores if rows >= 2 * num_cores * rm else 1
    tr = min(tr, _round_up(_ceil_div(rows, min_blocks), rm))
    return max(rm, tr)


@functools.partial(jax.jit, static_argnames=("tile_rows",))
def nanogpt_layer_norm(x, weight, bias=None, *, tile_rows=None):
    """x: (..., hidden); weight: (hidden,); bias: (hidden,) or None.
    Returns same shape/dtype as x."""
    orig_shape = x.shape
    hidden = orig_shape[-1]
    rows = int(math.prod(orig_shape[:-1])) if len(orig_shape) > 1 else 1

    if bias is None:
        bias = jnp.zeros((hidden,), weight.dtype)

    x2 = x.reshape(rows, hidden)
    w2 = weight.reshape(1, hidden)
    b2 = bias.reshape(1, hidden)

    target_bytes, vmem_limit, num_cores = _tpu_params()
    if tile_rows is None:
        tile_rows = _pick_tile_rows(rows, hidden, x.dtype, target_bytes, num_cores)

    # No wrapper-side padding: ragged tail block is handled by Pallas (OOB reads
    # only affect rows whose stores are masked; every reduction is per-row).
    grid_n = _ceil_div(rows, tile_rows)

    itemsize = jnp.dtype(x.dtype).itemsize
    cost = pl.CostEstimate(
        flops=8 * rows * hidden,
        transcendentals=rows,
        bytes_accessed=2 * rows * hidden * itemsize
        + 2 * hidden * jnp.dtype(weight.dtype).itemsize,
    )

    out = pl.pallas_call(
        _layernorm_kernel,
        out_shape=jax.ShapeDtypeStruct((rows, hidden), x.dtype),
        grid_spec=pltpu.PrefetchScalarGridSpec(
            num_scalar_prefetch=0,
            grid=(grid_n,),
            in_specs=[
                pl.BlockSpec((tile_rows, hidden), lambda i: (i, 0)),
                pl.BlockSpec((1, hidden), lambda i: (0, 0)),
                pl.BlockSpec((1, hidden), lambda i: (0, 0)),
            ],
            out_specs=pl.BlockSpec((tile_rows, hidden), lambda i: (i, 0)),
        ),
        compiler_params=pltpu.CompilerParams(
            dimension_semantics=("parallel",),
            vmem_limit_bytes=vmem_limit,
        ),
        cost_estimate=cost,
    )(x2, w2, b2)

    return out.reshape(orig_shape)


def _ref_layer_norm(x, weight, bias):
    xf = x.astype(jnp.float32)
    mean = jnp.mean(xf, axis=-1, keepdims=True)
    var = jnp.mean((xf - mean) ** 2, axis=-1, keepdims=True)
    y = (xf - mean) * jax.lax.rsqrt(var + EPS) * weight
    if bias is not None:
        y = y + bias
    return y.astype(x.dtype)


if __name__ == "__main__":
    # Module: NanoGPTLayerNorm(ndim=hidden, bias=True)
    batch, seq, hidden = 2, 8, 32

    key = jax.random.PRNGKey(0)
    kx, kw, kb = jax.random.split(key, 3)
    x = jax.random.normal(kx, (batch, seq, hidden), dtype=jnp.float32)

    # weight = ones(ndim), bias = zeros(ndim), perturbed deterministically so
    # the affine part is actually exercised.
    weight = jnp.ones((hidden,), jnp.float32) + 0.1 * jax.random.normal(
        kw, (hidden,), jnp.float32
    )
    bias = jnp.zeros((hidden,), jnp.float32) + 0.1 * jax.random.normal(
        kb, (hidden,), jnp.float32
    )

    out = jax.block_until_ready(nanogpt_layer_norm(x, weight, bias))
    ref = _ref_layer_norm(x, weight, bias)
    assert jnp.allclose(out, ref, atol=1e-5, rtol=1e-5), "mismatch vs reference"

    # Non-divisible row count -> exercises the unpadded ragged-tail (masked store) path.
    x_odd = jax.random.normal(kx, (3, 7, hidden), dtype=jnp.float32)
    out_odd = jax.block_until_ready(nanogpt_layer_norm(x_odd, weight, bias))
    ref_odd = _ref_layer_norm(x_odd, weight, bias)
    assert jnp.allclose(out_odd, ref_odd, atol=1e-5, rtol=1e-5), "tail mismatch"

    # bias=False variant of the module (bias parameter is None).
    out_nb = jax.block_until_ready(nanogpt_layer_norm(x, weight, None))
    ref_nb = _ref_layer_norm(x, weight, None)
    assert jnp.allclose(out_nb, ref_nb, atol=1e-5, rtol=1e-5), "no-bias mismatch"

    print("KERNEL_OK")
</pallas_src>

<mosaic_0001>
module attributes {stable_mosaic.version = 11 : i64} {
  func.func @_layernorm_kernel(%arg0: i32, %arg1: memref<8x32xf32, #tpu.memory_space<vmem>>, %arg2: memref<1x32xf32, #tpu.memory_space<vmem>>, %arg3: memref<1x32xf32, #tpu.memory_space<vmem>>, %arg4: memref<8x32xf32, #tpu.memory_space<vmem>>) attributes {dimension_semantics = [#tpu.dimension_semantics<parallel>], iteration_bounds = array<i64: 2>, scalar_prefetch = 0 : i64, scratch_operands = 0 : i64, tpu.core_type = #tpu.core_type<tc>, window_params = [{transform_indices = @transform_0, window_bounds = array<i64: 8, 32>}, {pipeline_mode = #tpu.pipeline_mode<synchronous>, transform_indices = @transform_1, window_bounds = array<i64: 1, 32>}, {pipeline_mode = #tpu.pipeline_mode<synchronous>, transform_indices = @transform_2, window_bounds = array<i64: 1, 32>}, {transform_indices = @transform_3, window_bounds = array<i64: 8, 32>}]} {
    %c0 = arith.constant 0 : index
    %c0_0 = arith.constant 0 : index
    %0 = vector.load %arg1[%c0, %c0_0] : memref<8x32xf32, #tpu.memory_space<vmem>>, vector<8x32xf32>
    %cst = arith.constant dense<0.000000e+00> : vector<8xf32>
    %1 = vector.multi_reduction <add>, %0, %cst [1] : vector<8x32xf32> to vector<8xf32>
    %2 = vector.shape_cast %1 : vector<8xf32> to vector<8x1xf32>
    %cst_1 = arith.constant 3.200000e+01 : f32
    %3 = vector.broadcast %cst_1 : f32 to vector<8x1xf32>
    %4 = arith.divf %2, %3 : vector<8x1xf32>
    %5 = vector.broadcast %4 : vector<8x1xf32> to vector<8x32xf32>
    %6 = arith.subf %0, %5 : vector<8x32xf32>
    %7 = arith.mulf %6, %6 : vector<8x32xf32>
    %cst_2 = arith.constant dense<0.000000e+00> : vector<8xf32>
    %8 = vector.multi_reduction <add>, %7, %cst_2 [1] : vector<8x32xf32> to vector<8xf32>
    %9 = vector.shape_cast %8 : vector<8xf32> to vector<8x1xf32>
    %cst_3 = arith.constant 3.200000e+01 : f32
    %10 = vector.broadcast %cst_3 : f32 to vector<8x1xf32>
    %11 = arith.divf %9, %10 : vector<8x1xf32>
    %cst_4 = arith.constant 9.99999974E-6 : f32
    %12 = vector.broadcast %cst_4 : f32 to vector<8x1xf32>
    %13 = arith.addf %11, %12 : vector<8x1xf32>
    %14 = math.rsqrt %13 : vector<8x1xf32>
    %15 = vector.broadcast %14 : vector<8x1xf32> to vector<8x32xf32>
    %16 = arith.mulf %6, %15 : vector<8x32xf32>
    %c0_5 = arith.constant 0 : index
    %c0_6 = arith.constant 0 : index
    %17 = vector.load %arg2[%c0_5, %c0_6] : memref<1x32xf32, #tpu.memory_space<vmem>>, vector<1x32xf32>
    %18 = vector.broadcast %17 : vector<1x32xf32> to vector<8x32xf32>
    %19 = arith.mulf %16, %18 : vector<8x32xf32>
    %c0_7 = arith.constant 0 : index
    %c0_8 = arith.constant 0 : index
    %20 = vector.load %arg3[%c0_7, %c0_8] : memref<1x32xf32, #tpu.memory_space<vmem>>, vector<1x32xf32>
    %21 = vector.broadcast %20 : vector<1x32xf32> to vector<8x32xf32>
    %22 = arith.addf %19, %21 : vector<8x32xf32>
    %c0_9 = arith.constant 0 : index
    %c0_10 = arith.constant 0 : index
    %23 = vector.load %arg4[%c0_9, %c0_10] : memref<8x32xf32, #tpu.memory_space<vmem>>, vector<8x32xf32>
    tpu.vector_store %arg4[%c0_9, %c0_10], %22 {strides = array<i32>} : memref<8x32xf32, #tpu.memory_space<vmem>>, vector<8x32xf32>,
    return
  }
  func.func @transform_0(%arg0: i32) -> (i32, i32) {
    %c0_i32 = arith.constant 0 : i32
    %c0_i32_0 = arith.constant 0 : i32
    return %arg0, %c0_i32 : i32, i32
  }
  func.func @transform_1(%arg0: i32) -> (i32, i32) {
    %c0_i32 = arith.constant 0 : i32
    %c0_i32_0 = arith.constant 0 : i32
    %c0_i32_1 = arith.constant 0 : i32
    return %c0_i32, %c0_i32_0 : i32, i32
  }
  func.func @transform_2(%arg0: i32) -> (i32, i32) {
    %c0_i32 = arith.constant 0 : i32
    %c0_i32_0 = arith.constant 0 : i32
    %c0_i32_1 = arith.constant 0 : i32
    return %c0_i32, %c0_i32_0 : i32, i32
  }
  func.func @transform_3(%arg0: i32) -> (i32, i32) {
    %c0_i32 = arith.constant 0 : i32
    %c0_i32_0 = arith.constant 0 : i32
    return %arg0, %c0_i32 : i32, i32
  }
}

</mosaic_0001>

<bundles_post_ra>
// kernel: nanogpt_layer_norm.1
= control target key start
LH: loop header
LB: loop body
LE: loop exit
PB: predicated region body
PF: predicated region fallthrough
CT: control target
= control target key end

     0   :  { %8 = vsyncpa [#allocation3], 0  ;;  %s640_s0 = inlined_call_operand.hbm [shape: f32[16,32], index: 0, kind: input, shape index: {}]   ;;  %s641_s1 = inlined_call_operand.vmem [shape: f32[1,32], index: 1, kind: input, shape index: {}]   ;;  %s642_s2 = inlined_call_operand.vmem [shape: f32[1,32], index: 2, kind: input, shape index: {}]   ;;  %s643_s3 = inlined_call_operand.hbm [shape: f32[16,32], index: 3, kind: output, shape index: {}]  }
   0x1   :  { %10 = vsyncpa [#allocation3 + $0x1], 0 }
   0x2   :  { %11 = vsyncpa [#allocation4], 0 }
   0x3   :  { %13 = vsyncpa [#allocation4 + $0x1], 0  ;;  %s500_s12 = smov 0   ;;  %s502_s13 = smov 0  }
   0x4   :  { %s504_s14 = smov 0   ;;  %s506_s15 = smov 0  }
   0x5 LB: > { %s521_s16 = sadd.s32 4294967295, %s477_s15   ;;  %s316_s17 = sadd.s32 4294967294, %s477_s15   ;;  %s477_s15 = sphi %s506_s15, %s653_s15   ;;  %s473_s14 = sphi %s504_s14, %s652_s14   ;;  %s469_s13 = sphi %s502_s13, %s651_s13   ;;  %s465_s12 = sphi %s500_s12, %s650_s12  }
   0x6   : > { %s525_s18 = sadd.s32 1, %s477_s15   ;;  %s26_s19 = sadd.s32 1, %s473_s14 }
   0x7   : > { %s23_s20 = ssub.s32 %s477_s15, %s525_s18  ;;  %p33_p0 = scmp.ne.s32.totalorder %s473_s14, %s469_s13 }
   0x8   : > { %p24_p1 = scmp.eq.s32.totalorder %s23_s20, 0  ;;  %p34_p2 = scmp.eq.s32.totalorder %s477_s15, 0 }
   0x9   : > { %p39_p3 = scmp.ne.s32.totalorder %s469_s13, %s465_s12  ;;  %p40_p4 = scmp.eq.s32.totalorder %s521_s16, 0 }
   0xa   : > { %s537_s21 = scalar_select %p24_p1, %s473_s14, %s26_s19  }
   0xb   : > { %p539_p5 = por %p34_p2, %p33_p0  ;;  %p543_p6 = por %p40_p4, %p39_p3 }
   0xc   : > { %p105_p7 = scmp.eq.s32.totalorder %s521_s16, 1  ;;  %p111_p8 = scmp.eq.s32.totalorder %s316_s17, 1 }
   0xd   : > { %p340_p10 = scmp.lt.s32.totalorder %s477_s15, 2  ;;  %s137_s26 = sand.u32 1, %s473_s14  }
   0xe   : > { %p550_p11 = por %p105_p7, %p33_p0  ;;  %p554_p12 = por %p111_p8, %p39_p3 }
   0xf   : > { %s320_s27 = sshll.u32 %s477_s15, 3  ;;  %s319_s28 = sshll.u32 %s137_s26, 3 }
  0x10   : > { %s145_s4 = scalar_lea.hbm %s640_s0, %s320_s27  ;;  %s141_s6 = scalar_lea.vmem [#allocation2], %s319_s28 }
  0x11   : > { %s147_s5 = sshll.u32 %s145_s4, 4  ;;  %s149_s7 = sshll.u32 %s141_s6, 4  ;;  %s148_s5 = int_to_ptr.hbm [resolvable:$true] %s147_s5  ;;  %s150_s7 = int_to_ptr.vmem [resolvable:$true] %s149_s7 }
  0x12   : > { %p565_p13 = pnand %p340_p10, %p539_p5  ;;  %p321_p0 = scmp.ge.s32.totalorder %s477_s15, 1 }
  0x13   : > { %p154_p1 = scmp.lt.s32.totalorder %s477_s15, 3  ;;  %s138_s9 = scalar_lea.sflag [#allocation3], %s137_s26 }
  0x14   : > { %s381_s10 = sshra.s32 %s148_s5, 4  ;;  %p385_p3 = pneg %p565_p13  ;;  %s382_s10 = int_to_ptr.hbm [resolvable:$true] %s381_s10 }
  0x15   : > { %s383_s11 = scalar_lea.hbm %s382_s10, 8  ;;  %s388_s20 = scalar_lea.hbm %s640_s0, 16 }
  0x16   : > { %p384_p2 = scmp.ne.s32.totalorder %s382_s10, %s383_s11  ;;  %p389_p5 = scmp.lt.s32.totalorder %s382_s10, %s640_s0 }
  0x17   : > { %p390_p8 = scmp.lt.s32.totalorder %s388_s20, %s383_s11 }
  0x18   : > { %p386_p4 = pnand %p385_p3, %p384_p2 }
  0x19   : > { %p391_p10 = por %p390_p8, %p389_p5 }
  0x1a   : > { %p387_p7 = pneg %p386_p4 }
  0x1c   : > { %p392_p9 = pnand %p391_p10, %p387_p7 }
  0x1e   : > { %395 = shalt.err (!%p392_p9)
}
  0x1f   : > { %335 = dma.hbm_to_vmem [thread:$0]  (!%p565_p13), %s148_s5, 128, %s150_s7, %s138_s9  }
  0x20   : > { %p155_p2 = pnand %p321_p0, %p154_p1 }
  0x21   : > { %s586_s26 = sand.u32 (!%p155_p2), 1, %s469_s13  }
  0x22   : > { %158 = sbr.rel (%p155_p2) target bundleno = 312 (0x138), region = 32  ;;  %s322_s28 = sshll.u32 (!%p155_p2), %s586_s26, 3 }
  0x23   : > { %s161_s29 = scalar_lea.sflag (!%p155_p2), [#allocation3], %s586_s26  ;;  %s164_s30 = scalar_lea.vmem (!%p155_p2), [#allocation2], %s322_s28 }
  0x27   : > { %456 = dma.done.wait (%p543_p6), %s161_s29, 128  }
  0x28   : > { %458 = vsyncadd (%p543_p6), %s161_s29, 4294967168  ;;  %vm189_vm0 = vcmask 261120   ;;  %v188_v0 = vld [vmem:[%s164_s30] sm:$0xff]  ;;  %v479_v2 = vmov 32.0   ;;  %s325_s23 = sshll.u32 %s521_s16, 3  ;;  %s187_s16 = scalar_lea.vmem [#allocation5], %s322_s28 }
  0x29   : > { %v190_v1 = vsel %vm189_vm0, %v188_v0, 0.0  ;;  %377 = vrcp.f32 %v479_v2  ;;  %v375_v23 = vld [vmem:[%s641_s1] ss:$0 sm:$0xff]  ;;  %s241_s8 = scalar_lea.hbm %s643_s3, %s325_s23  ;;  %s243_s11 = sshll.u32 %s187_s16, 4  ;;  %s244_s11 = int_to_ptr.vmem [resolvable:$true] %s243_s11 }
  0x2a   : > { %191 = vadd.xlane.f32.xlu0 %v190_v1  ;;  %v376_v26 = vld [vmem:[%s642_s2] ss:$0 sm:$0xff]  ;;  %s245_s17 = sshll.u32 %s241_s8, 4  ;;  %s231_s19 = scalar_lea.sflag [#allocation4], %s586_s26  ;;  %s246_s17 = int_to_ptr.hbm [resolvable:$true] %s245_s17 }
  0x2b   : > { %s425_s20 = sshra.s32 %s246_s17, 4  ;;  %s431_s28 = scalar_lea.hbm %s643_s3, 16  ;;  %s426_s20 = int_to_ptr.hbm [resolvable:$true] %s425_s20 }
  0x2c   : > { %s427_s22 = scalar_lea.hbm %s426_s20, 8  ;;  %p432_p0 = scmp.lt.s32.totalorder %s426_s20, %s643_s3 }
  0x2d   : > { %p428_p6 = scmp.ne.s32.totalorder %s426_s20, %s427_s22  ;;  %p433_p1 = scmp.lt.s32.totalorder %s431_s28, %s427_s22 }
  0x2f   : > { %v378_v3 = vpop.eup %377  ;;  %p429_p9 = pnand %p428_p6, %p550_p11  ;;  %p434_p3 = por %p433_p1, %p432_p0 }
  0x30   : > { %v194_v4 = vmul.f32 32.0, %v378_v3  ;;  %vm198_vm1 = vweird.f32 %v378_v3 }
  0x31   : > { %p430_p13 = pneg %p429_p9 }
  0x32   : > { %v195_v5 = vsub.f32 1.0, %v194_v4 }
  0x33   : > { %p435_p4 = pnand %p434_p3, %p430_p13 }
  0x34   : > { %v196_v6 = vmul.f32 %v378_v3, %v195_v5 }
  0x36   : > { %v197_v7 = vadd.f32 %v378_v3, %v196_v6 }
  0x38   : > { %v199_v8 = vsel %vm198_vm1, %v378_v3, %v197_v7 }
  0x9d   : > { %v192_v9 = vpop.xlane.xlu0 %191 }
  0x9e   : > { %v200_v10 = vmul.f32 %v199_v8, %v192_v9 }
  0xa0   : > { %v201_v11 = vsub.f32 %v188_v0, %v200_v10 }
  0xa2   : > { %v202_v12 = vmul.f32 %v201_v11, %v201_v11 }
  0xa4   : > { %v203_v13 = vsel %vm189_vm0, %v202_v12, 0.0 }
  0xa5   : > { %204 = vadd.xlane.f32.xlu0 %v203_v13 }
 0x118   : > { %v205_v14 = vpop.xlane.xlu0 %204 }
 0x119   : > { %v206_v15 = vmul.f32 %v205_v14, %v199_v8 }
 0x11b   : > { %v207_v16 = vadd.f32 1e-05, %v206_v15 }
 0x11d   : > { %379 = vrsqrt.f32 %v207_v16  ;;  %vm214_vm3 = vweird.f32 %v207_v16 }
 0x123   : > { %v380_v17 = vpop.eup %379 }
 0x124   : > { %v209_v18 = vmul.f32 %v380_v17, %v207_v16  ;;  %vm215_vm2 = vweird.f32 %v380_v17 }
 0x125   : > { %vm216_vm4 = vmor %vm214_vm3, %vm215_vm2 }
 0x126   : > { %v210_v19 = vmul.f32 %v380_v17, %v209_v18 }
 0x128   : > { %v211_v20 = vmul.f32 0.5, %v210_v19 }
 0x12a   : > { %v212_v21 = vsub.f32 1.5, %v211_v20 }
 0x12c   : > { %v213_v22 = vmul.f32 %v380_v17, %v212_v21 }
 0x12e   : > { %v217_v24 = vsel %vm216_vm4, %v380_v17, %v213_v22 }
 0x12f   : > { %v218_v25 = vmul.f32 %v217_v24, %v201_v11 }
 0x131   : > { %v223_v27 = vmul.f32 %v375_v23, %v218_v25 }
 0x133   : > { %v228_v28 = vadd.f32 %v376_v26, %v223_v27 }
 0x135   : > { %229 = vst.msk [vmem:[%s187_s16] sm:$0xff] %vm189_vm0, %v228_v28 }
 0x136   : > { %438 = shalt.err (!%p435_p4)
}
 0x137   : > { %330 = dma.vmem_to_hbm [thread:$0]  (%p550_p11), %s244_s11, 128, %s246_s17, %s231_s19  }
 0x138 PF: > { %s257_s26 = sand.u32 1, %s465_s12   ;;  %p649_p7 = scmp.ge.s32.totalorder %s477_s15, 2 }
 0x139   : > { %s258_s4 = scalar_lea.sflag [#allocation4], %s257_s26 }
 0x13a   : > { %p337_p5 = pnand %p649_p7, %p554_p12 }
 0x13c   : > { %p338_p8 = pneg %p337_p5 }
 0x13e   : > { %460 = dma.done.wait (%p338_p8), %s258_s4, 128  }
 0x13f   : > { %462 = vsyncadd (%p338_p8), %s258_s4, 4294967168  ;;  %p16_p10 = scmp.ge.s32.totalorder %s525_s18, 4   ;;  %s650_s12 = smov %s469_s13 }
 0x140   : > { %s651_s13 = smov %s473_s14  ;;  %s652_s14 = smov %s537_s21 }
 0x141   : > { %s653_s15 = smov %s525_s18  ;;  %18 = sbr.rel (!%p16_p10) target bundleno = 5 (0x5), region = 77 }
 0x146   :  { %264 = vsyncpa [#allocation3], 1 }
 0x147   :  { %266 = vsyncpa [#allocation3 + $0x1], 1 }
 0x148   :  { %267 = vsyncpa [#allocation4], 1 }
 0x149   :  { %269 = vsyncpa [#allocation4 + $0x1], 1 }

</bundles_post_ra>
